<compile_context>
chip_gen: v6e
topology: v6e:2x2x1
jax: 0.10.0
libtpu: 0.0.40
codegen_flags: <defaults>
</compile_context>

<pallas_src>
import functools

import jax
import jax.numpy as jnp
from jax.experimental import pallas as pl
from jax.experimental.pallas import tpu as pltpu

EXPANSION = 4          # ResNet bottleneck expansion
ROW_ALIGN = 16         # bf16 sublane packing
ROW_TILE = 256         # matmul row tile (256 suits v6e/v7x 256-wide MXU, fine on v5e)
POOL_TILE = 512        # row tile for pooling / reduction kernels
VMEM_LIMIT = 48 * 1024 * 1024   # explicit scoped-VMEM budget (< v7x 64 MiB physical)


def _round_up(x, m):
    return (x + m - 1) // m * m


def _pick_row_tile(m, cap):
    return _round_up(max(m, ROW_ALIGN), ROW_ALIGN) if m <= cap else cap


# ----------------------------- Pallas kernels ---------------------------------

def _mm_bias_kernel(x_ref, w_ref, b_ref, o_ref, *, relu):
    """o = maybe_relu(x @ w + bias); bf16 operands, f32 accumulate, f32 epilogue."""
    acc = jnp.dot(x_ref[...], w_ref[...], preferred_element_type=jnp.float32)
    acc = acc + b_ref[...]
    if relu:
        acc = jnp.maximum(acc, 0.0)
    o_ref[...] = acc.astype(o_ref.dtype)


def _mm_bias_res_relu_kernel(x_ref, w_ref, b_ref, id_ref, o_ref):
    """Fused bottleneck tail: o = relu(x @ w + bias + identity)."""
    acc = jnp.dot(x_ref[...], w_ref[...], preferred_element_type=jnp.float32)
    acc = acc + b_ref[...] + id_ref[...].astype(jnp.float32)
    o_ref[...] = jnp.maximum(acc, 0.0).astype(o_ref.dtype)


def _max_reduce_kernel(x_ref, o_ref):
    # x: (P, tm, C) stacked pooling windows -> max over the window axis.
    o_ref[...] = jnp.max(x_ref[...], axis=0)


def _avgpool_kernel(x_ref, o_ref, *, inv_hw):
    # Accumulate f32 sums into the resident output block across the grid axis.
    @pl.when(pl.program_id(0) == 0)
    def _():
        o_ref[...] = jnp.zeros_like(o_ref)

    o_ref[...] += jnp.sum(x_ref[...].astype(jnp.float32), axis=1)

    @pl.when(pl.program_id(0) == pl.num_programs(0) - 1)
    def _():
        o_ref[...] = o_ref[...] * inv_hw


# ----------------------------- Pallas wrappers ---------------------------------

@functools.partial(jax.jit, static_argnames=("relu", "out_dtype"))
def matmul_bias(x, w, bias, identity=None, *, relu, out_dtype=jnp.bfloat16):
    """Tiled (rows) fused conv-as-matmul: maybe_relu(x @ w + bias [+ identity]).

    x: (M, K), w: (K, N) with BN scale pre-folded, bias: (N,), identity: (M, N)|None.
    N is padded to a multiple of 128 for lane-dense stores; M padded to the row tile.
    """
    M, K = x.shape
    _, N = w.shape

    x = x.astype(jnp.bfloat16)
    w = w.astype(jnp.bfloat16)
    bias = bias.astype(jnp.float32)

    Np = _round_up(N, 128)
    if Np != N:
        w = jnp.pad(w, ((0, 0), (0, Np - N)))
        bias = jnp.pad(bias, (0, Np - N))
        if identity is not None:
            identity = jnp.pad(identity, ((0, 0), (0, Np - N)))

    tm = _pick_row_tile(M, ROW_TILE)
    Mp = _round_up(M, tm)
    if Mp != M:
        x = jnp.pad(x, ((0, Mp - M), (0, 0)))
        if identity is not None:
            identity = jnp.pad(identity, ((0, Mp - M), (0, 0)))

    bias2 = bias.reshape(1, Np)
    grid = (Mp // tm,)
    cparams = pltpu.CompilerParams(dimension_semantics=("parallel",),
                                   vmem_limit_bytes=VMEM_LIMIT)

    if identity is None:
        out = pl.pallas_call(
            functools.partial(_mm_bias_kernel, relu=relu),
            out_shape=jax.ShapeDtypeStruct((Mp, Np), out_dtype),
            grid=grid,
            in_specs=[
                pl.BlockSpec((tm, K), lambda i: (i, 0)),
                pl.BlockSpec((K, Np), lambda i: (0, 0)),
                pl.BlockSpec((1, Np), lambda i: (0, 0)),
            ],
            out_specs=pl.BlockSpec((tm, Np), lambda i: (i, 0)),
            compiler_params=cparams,
        )(x, w, bias2)
    else:
        identity = identity.astype(jnp.bfloat16)
        out = pl.pallas_call(
            _mm_bias_res_relu_kernel,
            out_shape=jax.ShapeDtypeStruct((Mp, Np), out_dtype),
            grid=grid,
            in_specs=[
                pl.BlockSpec((tm, K), lambda i: (i, 0)),
                pl.BlockSpec((K, Np), lambda i: (0, 0)),
                pl.BlockSpec((1, Np), lambda i: (0, 0)),
                pl.BlockSpec((tm, Np), lambda i: (i, 0)),
            ],
            out_specs=pl.BlockSpec((tm, Np), lambda i: (i, 0)),
            compiler_params=cparams,
        )(x, w, bias2, identity)

    if Mp != M or Np != N:
        out = out[:M, :N]
    return out


@jax.jit
def max_over_patches(stacked):
    """stacked: (P, M, C) pooling taps -> (M, C) max, tiled over rows."""
    P, M, C = stacked.shape
    tr = _pick_row_tile(M, POOL_TILE)
    Mp = _round_up(M, tr)
    if Mp != M:
        stacked = jnp.pad(stacked, ((0, 0), (0, Mp - M), (0, 0)))
    out = pl.pallas_call(
        _max_reduce_kernel,
        out_shape=jax.ShapeDtypeStruct((Mp, C), stacked.dtype),
        grid=(Mp // tr,),
        in_specs=[pl.BlockSpec((P, tr, C), lambda i: (0, i, 0))],
        out_specs=pl.BlockSpec((tr, C), lambda i: (i, 0)),
        compiler_params=pltpu.CompilerParams(dimension_semantics=("parallel",),
                                             vmem_limit_bytes=VMEM_LIMIT),
    )(stacked)
    return out[:M] if Mp != M else out


@jax.jit
def global_avg_pool(x_nhwc):
    """(N, H, W, C) -> (N, C) mean, tiled over spatial chunks, f32 accumulation."""
    N, H, W, C = x_nhwc.shape
    HW = H * W
    xr = x_nhwc.reshape(N, HW, C)
    ts = _pick_row_tile(HW, POOL_TILE)
    HWp = _round_up(HW, ts)
    if HWp != HW:
        xr = jnp.pad(xr, ((0, 0), (0, HWp - HW), (0, 0)))   # zeros: no effect on sum
    return pl.pallas_call(
        functools.partial(_avgpool_kernel, inv_hw=1.0 / float(HW)),
        out_shape=jax.ShapeDtypeStruct((N, C), jnp.float32),
        grid=(HWp // ts,),
        in_specs=[pl.BlockSpec((N, ts, C), lambda i: (0, i, 0))],
        out_specs=pl.BlockSpec((N, C), lambda i: (0, 0)),
        compiler_params=pltpu.CompilerParams(dimension_semantics=("arbitrary",),
                                             vmem_limit_bytes=VMEM_LIMIT),
    )(xr)


# ----------------------------- conv / pool glue ---------------------------------

def _im2col(x, kh, kw, stride, pad, pad_value=0.0):
    """x: (N,H,W,C) NHWC -> (N*OH*OW, kh*kw*C) patches.  Pure reshape/slice glue."""
    N, H, W, C = x.shape
    xp = jnp.pad(x, ((0, 0), (pad, pad), (pad, pad), (0, 0)),
                 constant_values=pad_value)
    OH = (H + 2 * pad - kh) // stride + 1
    OW = (W + 2 * pad - kw) // stride + 1
    patches = []
    for i in range(kh):
        for j in range(kw):
            patches.append(xp[:, i:i + stride * OH:stride, j:j + stride * OW:stride, :])
    col = jnp.concatenate(patches, axis=-1)          # (N, OH, OW, kh*kw*C)
    return col.reshape(N * OH * OW, kh * kw * C), OH, OW


def conv_bn(x, p, *, stride, pad, relu, identity=None, out_dtype=jnp.bfloat16):
    """Conv2d(bias=False) + folded BN [+ residual add] [+ ReLU] via Pallas matmul."""
    kh, kw = p["kh"], p["kw"]
    N, H, W, C = x.shape
    cout = p["bias"].shape[0]
    if kh == 1 and kw == 1:
        # 1x1 conv: plain matmul; strided 1x1 just subsamples spatially.
        if stride > 1:
            x = x[:, ::stride, ::stride, :]
        OH, OW = x.shape[1], x.shape[2]
        col = x.reshape(N * OH * OW, C)
    else:
        col, OH, OW = _im2col(x, kh, kw, stride, pad)
    col = col.astype(jnp.bfloat16)
    id2d = None
    if identity is not None:
        id2d = identity.reshape(N * OH * OW, cout)
    out = matmul_bias(col, p["wmat"], p["bias"], id2d, relu=relu, out_dtype=out_dtype)
    return out.reshape(N, OH, OW, cout)


def max_pool_3x3_s2_p1(x):
    """3x3 stride-2 max pool, padding=1; taps reduced inside a tiled Pallas kernel."""
    N, H, W, C = x.shape
    k, s, pad = 3, 2, 1
    neg = jnp.asarray(jnp.finfo(x.dtype).min, x.dtype)   # bf16-safe pad value
    xp = jnp.pad(x, ((0, 0), (pad, pad), (pad, pad), (0, 0)), constant_values=neg)
    OH = (H + 2 * pad - k) // s + 1
    OW = (W + 2 * pad - k) // s + 1
    patches = [xp[:, i:i + s * OH:s, j:j + s * OW:s, :]
               for i in range(k) for j in range(k)]
    stacked = jnp.stack(patches, axis=0).reshape(k * k, N * OH * OW, C)
    out = max_over_patches(stacked)
    return out.reshape(N, OH, OW, C)


# ----------------------------- parameters ---------------------------------

def _init_conv_bn(key, cin, cout, kh, kw, eps=1e-5):
    kw_, kg, kb, km, kv = jax.random.split(key, 5)
    w = 0.05 * jax.random.normal(kw_, (cout, cin, kh, kw), jnp.float32)
    gamma = 1.0 + 0.1 * jax.random.normal(kg, (cout,), jnp.float32)
    beta = 0.1 * jax.random.normal(kb, (cout,), jnp.float32)
    mean = 0.1 * jax.random.normal(km, (cout,), jnp.float32)
    var = 1.0 + 0.1 * jnp.abs(jax.random.normal(kv, (cout,), jnp.float32))
    scale = gamma * jax.lax.rsqrt(var + eps)
    shift = beta - mean * scale
    # Fold BN scale into the weight columns; keep only the shift (bias) in-kernel.
    wmat = jnp.transpose(w, (2, 3, 1, 0)).reshape(kh * kw * cin, cout)
    wmat = (wmat * scale[None, :]).astype(jnp.bfloat16)
    return {"wmat": wmat, "bias": shift.astype(jnp.float32), "kh": kh, "kw": kw}


def init_params(key, *, in_ch=3, base=16, blocks=(1, 1, 1, 1), num_classes=10):
    params = {}
    key, k = jax.random.split(key)
    params["stem"] = _init_conv_bn(k, in_ch, base, 7, 7)
    cin = base
    layers = []
    for width, stride, nblocks in zip(
            (base, base * 2, base * 4, base * 8), (1, 2, 2, 2), blocks):
        layer = []
        for b in range(nblocks):
            s = stride if b == 0 else 1
            key, k1, k2, k3, k4 = jax.random.split(key, 5)
            blk = {
                "stride": s,
                "conv1": _init_conv_bn(k1, cin, width, 1, 1),
                "conv2": _init_conv_bn(k2, width, width, 3, 3),
                "conv3": _init_conv_bn(k3, width, width * EXPANSION, 1, 1),
            }
            if s != 1 or cin != width * EXPANSION:
                blk["downsample"] = _init_conv_bn(k4, cin, width * EXPANSION, 1, 1)
            layer.append(blk)
            cin = width * EXPANSION
        layers.append(layer)
    params["layers"] = layers
    key, kfw, kfb = jax.random.split(key, 3)
    params["fc_wmat"] = (0.05 * jax.random.normal(kfw, (cin, num_classes),
                                                  jnp.float32)).astype(jnp.bfloat16)
    params["fc_b"] = 0.1 * jax.random.normal(kfb, (num_classes,), jnp.float32)
    return params


# ----------------------------- forward ---------------------------------

def bottleneck_block(x, blk):
    s = blk["stride"]
    if "downsample" in blk:
        identity = conv_bn(x, blk["downsample"], stride=s, pad=0, relu=False)
    else:
        identity = x
    out = conv_bn(x, blk["conv1"], stride=1, pad=0, relu=True)
    out = conv_bn(out, blk["conv2"], stride=s, pad=1, relu=True)
    # conv3 + BN + residual add + ReLU fused into one Pallas kernel.
    out = conv_bn(out, blk["conv3"], stride=1, pad=0, relu=True, identity=identity)
    return out


def modified_resnet_forward(params, x_nchw):
    """Returns (logits, features) like ModifiedResNet.forward.  features is NCHW."""
    x = jnp.transpose(x_nchw, (0, 2, 3, 1)).astype(jnp.float32)   # NCHW -> NHWC
    x = conv_bn(x, params["stem"], stride=2, pad=3, relu=True)    # conv1+bn1+relu
    x = max_pool_3x3_s2_p1(x)                                     # maxpool
    for layer in params["layers"]:                                # layer1..layer4
        for blk in layer:
            x = bottleneck_block(x, blk)
    features = jnp.transpose(x, (0, 3, 1, 2)).astype(jnp.float32)  # NCHW features
    pooled = global_avg_pool(x)                                    # avgpool + flatten
    logits = matmul_bias(pooled, params["fc_wmat"], params["fc_b"], None,
                         relu=False, out_dtype=jnp.float32)        # fc
    return logits, features


# ----------------------------- main ---------------------------------

if __name__ == "__main__":
    key = jax.random.PRNGKey(0)
    kp, kx = jax.random.split(key)
    params = init_params(kp, in_ch=3, base=16, blocks=(1, 1, 1, 1), num_classes=10)
    x = jax.random.normal(kx, (2, 3, 32, 32), jnp.float32)   # NCHW, like PyTorch
    logits, features = modified_resnet_forward(params, x)
    jax.block_until_ready((logits, features))
    assert logits.shape == (2, 10), logits.shape
    assert features.shape == (2, 16 * 8 * EXPANSION, 1, 1), features.shape
    print("KERNEL_OK")
</pallas_src>

<mosaic_0001>
module attributes {stable_mosaic.version = 11 : i64} {
  func.func @_mm_bias_kernel(%arg0: i32, %arg1: memref<256x147xbf16, #tpu.memory_space<vmem>>, %arg2: memref<147x128xbf16, #tpu.memory_space<vmem>>, %arg3: memref<1x128xf32, #tpu.memory_space<vmem>>, %arg4: memref<256x128xbf16, #tpu.memory_space<vmem>>) attributes {dimension_semantics = [#tpu.dimension_semantics<parallel>], iteration_bounds = array<i64: 2>, scalar_prefetch = 0 : i64, scratch_operands = 0 : i64, tpu.core_type = #tpu.core_type<tc>, window_params = [{transform_indices = @transform_0, window_bounds = array<i64: 256, 147>}, {pipeline_mode = #tpu.pipeline_mode<synchronous>, transform_indices = @transform_1, window_bounds = array<i64: 147, 128>}, {pipeline_mode = #tpu.pipeline_mode<synchronous>, transform_indices = @transform_2, window_bounds = array<i64: 1, 128>}, {transform_indices = @transform_3, window_bounds = array<i64: 256, 128>}]} {
    %c0 = arith.constant 0 : index
    %c0_0 = arith.constant 0 : index
    %0 = vector.load %arg1[%c0, %c0_0] : memref<256x147xbf16, #tpu.memory_space<vmem>>, vector<256x147xbf16>
    %c0_1 = arith.constant 0 : index
    %c0_2 = arith.constant 0 : index
    %1 = vector.load %arg2[%c0_1, %c0_2] : memref<147x128xbf16, #tpu.memory_space<vmem>>, vector<147x128xbf16>
    %cst = arith.constant dense<0.000000e+00> : vector<256x128xf32>
    %2 = tpu.matmul %0, %1, %cst {dimension_numbers = #tpu.dot_dimension_numbers<[1], [0], [0], [1], [0, 0, 1, 1], [], []>} : vector<256x147xbf16>, vector<147x128xbf16>, vector<256x128xf32> -> vector<256x128xf32>
    %c0_3 = arith.constant 0 : index
    %c0_4 = arith.constant 0 : index
    %3 = vector.load %arg3[%c0_3, %c0_4] : memref<1x128xf32, #tpu.memory_space<vmem>>, vector<1x128xf32>
    %4 = vector.broadcast %3 : vector<1x128xf32> to vector<256x128xf32>
    %5 = arith.addf %2, %4 : vector<256x128xf32>
    %cst_5 = arith.constant 0.000000e+00 : f32
    %6 = vector.broadcast %cst_5 : f32 to vector<256x128xf32>
    %7 = arith.maximumf %5, %6 : vector<256x128xf32>
    %8 = arith.truncf %7 : vector<256x128xf32> to vector<256x128xbf16>
    %c0_6 = arith.constant 0 : index
    %c0_7 = arith.constant 0 : index
    %9 = vector.load %arg4[%c0_6, %c0_7] : memref<256x128xbf16, #tpu.memory_space<vmem>>, vector<256x128xbf16>
    tpu.vector_store %arg4[%c0_6, %c0_7], %8 {strides = array<i32>} : memref<256x128xbf16, #tpu.memory_space<vmem>>, vector<256x128xbf16>,
    return
  }
  func.func @transform_0(%arg0: i32) -> (i32, i32) {
    %c0_i32 = arith.constant 0 : i32
    %c0_i32_0 = arith.constant 0 : i32
    return %arg0, %c0_i32 : i32, i32
  }
  func.func @transform_1(%arg0: i32) -> (i32, i32) {
    %c0_i32 = arith.constant 0 : i32
    %c0_i32_0 = arith.constant 0 : i32
    %c0_i32_1 = arith.constant 0 : i32
    return %c0_i32, %c0_i32_0 : i32, i32
  }
  func.func @transform_2(%arg0: i32) -> (i32, i32) {
    %c0_i32 = arith.constant 0 : i32
    %c0_i32_0 = arith.constant 0 : i32
    %c0_i32_1 = arith.constant 0 : i32
    return %c0_i32, %c0_i32_0 : i32, i32
  }
  func.func @transform_3(%arg0: i32) -> (i32, i32) {
    %c0_i32 = arith.constant 0 : i32
    %c0_i32_0 = arith.constant 0 : i32
    return %arg0, %c0_i32 : i32, i32
  }
}

</mosaic_0001>

<bundles_post_ra>
// kernel: matmul_bias.1
= control target key start
LH: loop header
LB: loop body
LE: loop exit
PB: predicated region body
PF: predicated region fallthrough
CT: control target
= control target key end

     0   :  { %s1251_s12 = smov 0   ;;  %s1407_s0 = inlined_call_operand.vmem [shape: bf16[512,147], index: 0, kind: input, shape index: {}]   ;;  %s1408_s1 = inlined_call_operand.vmem [shape: bf16[147,128], index: 1, kind: input, shape index: {}]   ;;  %s1409_s2 = inlined_call_operand.vmem [shape: f32[1,128], index: 2, kind: input, shape index: {}]   ;;  %s1410_s3 = inlined_call_operand.vmem [shape: bf16[512,128], index: 3, kind: output, shape index: {}]  }
   0x1 LB: > { %s902_s13 = sadd.s32 4294967295, %s1227_s12   ;;  %p906_p0 = scmp.ge.s32.totalorder %s1227_s12, 1  ;;  %s1227_s12 = sphi %s1251_s12, %s13_s12  }
   0x2   : > { %p139_p1 = scmp.lt.s32.totalorder %s1227_s12, 3 }
   0x4   : > { %p140_p2 = pnand %p906_p0, %p139_p1 }
   0x5   : > { %s907_s20 = sshll.u32 (!%p140_p2), %s902_s13, 5 }
   0x6   : > { %143 = sbr.rel (%p140_p2) target bundleno = 312 (0x138), region = 32  ;;  %p165_p3 = scmp.lt.s32.totalorder (!%p140_p2), %s907_s20, 63 }
   0xb   : > { %v1163_v0 = vld [vmem:[%s1408_s1 + $0x38] sm:$0xff]   ;;  %v1229_v1 = vmov 0   ;;  %v1164_v2 = vld [vmem:[%s1408_s1 + $0x30] sm:$0xff]   ;;  %v1165_v3 = vld [vmem:[%s1408_s1 + $0x28] sm:$0xff]   ;;  %s1412_s20 = smov (!%p165_p3, %s907_s20), 63  ;;  %vm437_vm0 = vcmask 154624  }
   0xc   : > { %493 = vmatprep.subr.bf16.mxu0 %v1229_v1  ;;  %1133 = vmatprep.subr.bf16.mxu1 %v1229_v1  ;;  %v1166_v4 = vld [vmem:[%s1408_s1 + $0x20] sm:$0xff]   ;;  %s1005_s23 = sshll.u32 %s1412_s20, 3  ;;  %v1167_v5 = vld [vmem:[%s1408_s1 + $0x18] sm:$0xff]   ;;  %v1168_v8 = vld [vmem:[%s1408_s1 + $0x10] sm:$0xff]   ;;  %vm486_vm1 = vcmask 1040384   ;;  %vm487_vm2 = vcmask 1041408  }
   0xd   : > { %494 = vmatpush1.bf16.msra.mxu0 %v1163_v0  ;;  %1143 = vmatpush1.bf16.msra.mxu1 %v1163_v0  ;;  %s1277_s26 = scalar_lea.vmem %s1407_s0, %s1005_s23  ;;  %v1169_v9 = vld [vmem:[%s1408_s1 + $0x8] sm:$0xff]   ;;  %v1230_v10 = vmov 65535   ;;  %v1170_v12 = vld [vmem:[%s1408_s1] sm:$0xff]   ;;  %s911_s15 = sshll.u32 %s1412_s20, 2 }
   0xe   : > { %495 = vmatprep.subr.bf16.mxu0 %v1229_v1  ;;  %1134 = vmatprep.subr.bf16.mxu1 %v1229_v1  ;;  %v1175_v6 = vld [vmem:[%s1277_s26 + $0x4] ss:$8 sps:$4 sm:$0xff]   ;;  %v488_v11 = vsel %vm486_vm1, 4294967295, %v1230_v10  ;;  %v1171_v13 = vld [vmem:[%s1408_s1 + $0x48] ss:$0 sps:$4 sm:$0x33]   ;;  %s1358_s18 = scalar_lea.vmem %s1410_s3, %s911_s15 }
   0xf   : > { %v1178_v7 = vld [vmem:[%s1277_s26 + $0x84] ss:$8 sps:$4 sm:$0xff]   ;;  %955 = vmatprep.mubr.msk.bf16.mxu0 %vm437_vm0, %v1175_v6  ;;  %v489_v14 = vsel %vm487_vm2, %v488_v11, 0  ;;  %v1173_v17 = vld [vmem:[%s1277_s26] ss:$8 sps:$4 sm:$0xff]  }
  0x10   : > { %963 = vmatprep.mubr.msk.bf16.mxu1 %vm437_vm0, %v1178_v7  ;;  %v491_v15 = vand.u32 %v1171_v13, %v489_v14  ;;  %v1172_v16 = vld [vmem:[%s1408_s1 + $0x40] sm:$0xff]   ;;  %v1179_v19 = vld [vmem:[%s1277_s26 + $0x14] ss:$8 sps:$4 sm:$0xff]   ;;  %v1183_v21 = vld [vmem:[%s1277_s26 + $0x10] ss:$8 sps:$4 sm:$0xff]  }
  0x11   : > { %496 = vmatpush1.bf16.msra.mxu0 %v1164_v2  ;;  %1144 = vmatpush1.bf16.msra.mxu1 %v1164_v2  ;;  %v1176_v18 = vld [vmem:[%s1277_s26 + $0x80] ss:$8 sps:$4 sm:$0xff]   ;;  %v1181_v20 = vld [vmem:[%s1277_s26 + $0x94] ss:$8 sps:$4 sm:$0xff]   ;;  %v1184_v22 = vld [vmem:[%s1277_s26 + $0x90] ss:$8 sps:$4 sm:$0xff]  }
  0x12   : > { %497 = vmatprep.subr.bf16.mxu0 %v1229_v1  ;;  %1135 = vmatprep.subr.bf16.mxu1 %v1229_v1  ;;  %v1185_v23 = vld [vmem:[%s1277_s26 + $0x24] ss:$8 sps:$4 sm:$0xff]   ;;  %v1189_v25 = vld [vmem:[%s1277_s26 + $0x20] ss:$8 sps:$4 sm:$0xff]   ;;  %v1191_v27 = vld [vmem:[%s1277_s26 + $0x34] ss:$8 sps:$4 sm:$0xff]  }
  0x13   : > { %v1187_v24 = vld [vmem:[%s1277_s26 + $0xa4] ss:$8 sps:$4 sm:$0xff]   ;;  %v1190_v26 = vld [vmem:[%s1277_s26 + $0xa0] ss:$8 sps:$4 sm:$0xff]   ;;  %v1193_v28 = vld [vmem:[%s1277_s26 + $0xb4] ss:$8 sps:$4 sm:$0xff]  }
  0x14   : > { %v1195_v29 = vld [vmem:[%s1277_s26 + $0x30] ss:$8 sps:$4 sm:$0xff]   ;;  %v1197_v31 = vld [vmem:[%s1277_s26 + $0x44] ss:$8 sps:$4 sm:$0xff]   ;;  %v1201_v33 = vld [vmem:[%s1277_s26 + $0x40] ss:$8 sps:$4 sm:$0xff]  }
  0x15   : > { %498 = vmatpush1.bf16.msra.mxu0 %v1165_v3  ;;  %1145 = vmatpush1.bf16.msra.mxu1 %v1165_v3  ;;  %v1196_v30 = vld [vmem:[%s1277_s26 + $0xb0] ss:$8 sps:$4 sm:$0xff]   ;;  %v1199_v32 = vld [vmem:[%s1277_s26 + $0xc4] ss:$8 sps:$4 sm:$0xff]   ;;  %v1202_v34 = vld [vmem:[%s1277_s26 + $0xc0] ss:$8 sps:$4 sm:$0xff]  }
  0x16   : > { %499 = vmatprep.subr.bf16.mxu0 %v1229_v1  ;;  %1136 = vmatprep.subr.bf16.mxu1 %v1229_v1  ;;  %v1203_v35 = vld [vmem:[%s1277_s26 + $0x54] ss:$8 sps:$4 sm:$0xff]   ;;  %v1207_v37 = vld [vmem:[%s1277_s26 + $0x50] ss:$8 sps:$4 sm:$0xff]   ;;  %v1209_v39 = vld [vmem:[%s1277_s26 + $0x64] ss:$8 sps:$4 sm:$0xff]  }
  0x17   : > { %v1205_v36 = vld [vmem:[%s1277_s26 + $0xd4] ss:$8 sps:$4 sm:$0xff]   ;;  %v1208_v38 = vld [vmem:[%s1277_s26 + $0xd0] ss:$8 sps:$4 sm:$0xff]   ;;  %v1211_v40 = vld [vmem:[%s1277_s26 + $0xe4] ss:$8 sps:$4 sm:$0xff]  }
  0x18   : > { %v1213_v41 = vld [vmem:[%s1277_s26 + $0x60] ss:$8 sps:$4 sm:$0xff]   ;;  %v1215_v43 = vld [vmem:[%s1277_s26 + $0x74] ss:$8 sps:$4 sm:$0xff]   ;;  %v1219_v45 = vld [vmem:[%s1277_s26 + $0x70] ss:$8 sps:$4 sm:$0xff]  }
  0x19   : > { %500 = vmatpush1.bf16.msra.mxu0 %v1166_v4  ;;  %1146 = vmatpush1.bf16.msra.mxu1 %v1166_v4  ;;  %v1214_v42 = vld [vmem:[%s1277_s26 + $0xe0] ss:$8 sps:$4 sm:$0xff]   ;;  %v1217_v44 = vld [vmem:[%s1277_s26 + $0xf4] ss:$8 sps:$4 sm:$0xff]   ;;  %v1220_v46 = vld [vmem:[%s1277_s26 + $0xf0] ss:$8 sps:$4 sm:$0xff]  }
  0x1a   : > { %501 = vmatprep.subr.bf16.mxu0 %v1229_v1  ;;  %1137 = vmatprep.subr.bf16.mxu1 %v1229_v1  ;;  %v1348_v47 = vld [vmem:[%s1409_s2] ss:$0 sm:$0xff] }
  0x1d   : > { %502 = vmatpush1.bf16.msra.mxu0 %v1167_v5  ;;  %1147 = vmatpush1.bf16.msra.mxu1 %v1167_v5 }
  0x1e   : > { %503 = vmatprep.subr.bf16.mxu0 %v1229_v1  ;;  %1138 = vmatprep.subr.bf16.mxu1 %v1229_v1 }
  0x21   : > { %504 = vmatpush1.bf16.msra.mxu0 %v1168_v8  ;;  %1148 = vmatpush1.bf16.msra.mxu1 %v1168_v8 }
  0x22   : > { %505 = vmatprep.subr.bf16.mxu0 %v1229_v1  ;;  %1139 = vmatprep.subr.bf16.mxu1 %v1229_v1 }
  0x25   : > { %506 = vmatpush1.bf16.msra.mxu0 %v1169_v9  ;;  %1149 = vmatpush1.bf16.msra.mxu1 %v1169_v9 }
  0x26   : > { %507 = vmatprep.subr.bf16.mxu0 %v1229_v1  ;;  %1140 = vmatprep.subr.bf16.mxu1 %v1229_v1 }
  0x29   : > { %508 = vmatpush1.bf16.msra.mxu0 %v1170_v12  ;;  %1150 = vmatpush1.bf16.msra.mxu1 %v1170_v12 }
  0x2a   : > { %521 = vmatprep.subr.bf16.mxu0 %v1229_v1  ;;  %1141 = vmatprep.subr.bf16.mxu1 %v1229_v1 }
  0x2d   : > { %522 = vmatpush2.bf16.msra.mxu0 %v491_v15  ;;  %1151 = vmatpush2.bf16.msra.mxu1 %v491_v15 }
  0x2e   : > { %523 = vmatprep.subr.bf16.mxu0 %v1229_v1  ;;  %1142 = vmatprep.subr.bf16.mxu1 %v1229_v1 }
  0x31   : > { %524 = vmatpush2.bf16.msra.mxu0 %v1172_v16  ;;  %1152 = vmatpush2.bf16.msra.mxu1 %v1172_v16 }
  0x34   : > { %526 = vmatmul.mubr.bf16.vlgmr.msra.gmra.mxu0 %v1173_v17  ;;  %590 = vmatmul.mubr.bf16.vlgmr.msra.gmra.mxu1 %v1176_v18 }
  0x35   : > { %956 = vmatprep.mubr.msk.bf16.mxu0 %vm437_vm0, %v1179_v19  ;;  %964 = vmatprep.mubr.msk.bf16.mxu1 %vm437_vm0, %v1181_v20 }
  0x3c   : > { %534 = vmatmul.mubr.bf16.gmra.mxu0 %v1183_v21  ;;  %598 = vmatmul.mubr.bf16.gmra.mxu1 %v1184_v22 }
  0x3d   : > { %957 = vmatprep.mubr.msk.bf16.mxu0 %vm437_vm0, %v1185_v23  ;;  %965 = vmatprep.mubr.msk.bf16.mxu1 %vm437_vm0, %v1187_v24 }
  0x44   : > { %542 = vmatmul.mubr.bf16.gmra.mxu0 %v1189_v25  ;;  %606 = vmatmul.mubr.bf16.gmra.mxu1 %v1190_v26 }
  0x45   : > { %958 = vmatprep.mubr.msk.bf16.mxu0 %vm437_vm0, %v1191_v27  ;;  %966 = vmatprep.mubr.msk.bf16.mxu1 %vm437_vm0, %v1193_v28 }
  0x4c   : > { %550 = vmatmul.mubr.bf16.gmra.mxu0 %v1195_v29  ;;  %614 = vmatmul.mubr.bf16.gmra.mxu1 %v1196_v30 }
  0x4d   : > { %959 = vmatprep.mubr.msk.bf16.mxu0 %vm437_vm0, %v1197_v31  ;;  %967 = vmatprep.mubr.msk.bf16.mxu1 %vm437_vm0, %v1199_v32 }
  0x54   : > { %558 = vmatmul.mubr.bf16.gmra.mxu0 %v1201_v33  ;;  %622 = vmatmul.mubr.bf16.gmra.mxu1 %v1202_v34 }
  0x55   : > { %960 = vmatprep.mubr.msk.bf16.mxu0 %vm437_vm0, %v1203_v35  ;;  %968 = vmatprep.mubr.msk.bf16.mxu1 %vm437_vm0, %v1205_v36 }
  0x5c   : > { %566 = vmatmul.mubr.bf16.gmra.mxu0 %v1207_v37  ;;  %630 = vmatmul.mubr.bf16.gmra.mxu1 %v1208_v38 }
  0x5d   : > { %961 = vmatprep.mubr.msk.bf16.mxu0 %vm437_vm0, %v1209_v39  ;;  %969 = vmatprep.mubr.msk.bf16.mxu1 %vm437_vm0, %v1211_v40 }
  0x64   : > { %574 = vmatmul.mubr.bf16.gmra.mxu0 %v1213_v41  ;;  %638 = vmatmul.mubr.bf16.gmra.mxu1 %v1214_v42 }
  0x65   : > { %962 = vmatprep.mubr.msk.bf16.mxu0 %vm437_vm0, %v1215_v43  ;;  %970 = vmatprep.mubr.msk.bf16.mxu1 %vm437_vm0, %v1217_v44 }
  0x6c   : > { %582 = vmatmul.mubr.bf16.gmra.mxu0 %v1219_v45  ;;  %646 = vmatmul.mubr.bf16.gmra.mxu1 %v1220_v46 }
  0xf4   : > { %v527_v48 = vpop.f32.mrf.mxu0  ;;  %v591_v49 = vpop.f32.mrf.mxu1 }
  0xf5   : > { %v528_v52 = vadd.f32 %v1348_v47, %v527_v48  ;;  %v592_v53 = vadd.f32 %v1348_v47, %v591_v49 }
  0xf6   : > { %v529_v50 = vpop.f32.mrf.mxu0  ;;  %v593_v51 = vpop.f32.mrf.mxu1 }
  0xf7   : > { %v654_v60 = vmax.f32 %v528_v52, 0.0  ;;  %v670_v61 = vmax.f32 %v592_v53, 0.0 }
  0xf8   : > { %v530_v54 = vpop.f32.mrf.mxu0  ;;  %v594_v55 = vpop.f32.mrf.mxu1 }
  0xf9   : > { %v531_v56 = vadd.f32 %v1348_v47, %v530_v54  ;;  %v595_v57 = vadd.f32 %v1348_v47, %v594_v55 }
  0xfa   : > { %v532_v58 = vpop.f32.mrf.mxu0  ;;  %v596_v59 = vpop.f32.mrf.mxu1 }
  0xfb   : > { %v655_v62 = vmax.f32 %v531_v56, 0.0  ;;  %v671_v63 = vmax.f32 %v595_v57, 0.0 }
  0xfc   : > { %v535_v0 = vpop.f32.mrf.mxu0  ;;  %v599_v1 = vpop.f32.mrf.mxu1 }
  0xfd   : > { %v1041_v2 = vpack.c.bf16 %v655_v62, %v654_v60  ;;  %v1081_v3 = vpack.c.bf16 %v671_v63, %v670_v61  ;;  %v536_v6 = vadd.f32 %v1348_v47, %v535_v0  ;;  %v600_v7 = vadd.f32 %v1348_v47, %v599_v1 }
  0xfe   : > { %v537_v4 = vpop.f32.mrf.mxu0  ;;  %v601_v5 = vpop.f32.mrf.mxu1 }
  0xff   : > { %1042 = vst [vmem:[%s1358_s18] sm:$0xff] %v1041_v2   ;;  %1125 = vst [vmem:[%s1358_s18 + $0x40] sm:$0xff] %v1081_v3   ;;  %v656_v14 = vmax.f32 %v536_v6, 0.0  ;;  %v672_v15 = vmax.f32 %v600_v7, 0.0 }
 0x100   : > { %v538_v8 = vpop.f32.mrf.mxu0  ;;  %v602_v9 = vpop.f32.mrf.mxu1 }
 0x101   : > { %v539_v10 = vadd.f32 %v1348_v47, %v538_v8  ;;  %v603_v11 = vadd.f32 %v1348_v47, %v602_v9 }
 0x102   : > { %v540_v12 = vpop.f32.mrf.mxu0  ;;  %v604_v13 = vpop.f32.mrf.mxu1 }
 0x103   : > { %v657_v16 = vmax.f32 %v539_v10, 0.0  ;;  %v673_v17 = vmax.f32 %v603_v11, 0.0 }
 0x104   : > { %v543_v18 = vpop.f32.mrf.mxu0  ;;  %v607_v19 = vpop.f32.mrf.mxu1 }
 0x105   : > { %v1046_v20 = vpack.c.bf16 %v657_v16, %v656_v14  ;;  %v1086_v21 = vpack.c.bf16 %v673_v17, %v672_v15  ;;  %v544_v24 = vadd.f32 %v1348_v47, %v543_v18  ;;  %v608_v25 = vadd.f32 %v1348_v47, %v607_v19 }
 0x106   : > { %v545_v22 = vpop.f32.mrf.mxu0  ;;  %v609_v23 = vpop.f32.mrf.mxu1 }
 0x107   : > { %1118 = vst [vmem:[%s1358_s18 + $0x8] sm:$0xff] %v1046_v20   ;;  %1126 = vst [vmem:[%s1358_s18 + $0x48] sm:$0xff] %v1086_v21   ;;  %v658_v32 = vmax.f32 %v544_v24, 0.0  ;;  %v674_v33 = vmax.f32 %v608_v25, 0.0 }
 0x108   : > { %v546_v26 = vpop.f32.mrf.mxu0  ;;  %v610_v27 = vpop.f32.mrf.mxu1 }
 0x109   : > { %v547_v28 = vadd.f32 %v1348_v47, %v546_v26  ;;  %v611_v29 = vadd.f32 %v1348_v47, %v610_v27 }
 0x10a   : > { %v548_v30 = vpop.f32.mrf.mxu0  ;;  %v612_v31 = vpop.f32.mrf.mxu1 }
 0x10b   : > { %v659_v34 = vmax.f32 %v547_v28, 0.0  ;;  %v675_v35 = vmax.f32 %v611_v29, 0.0 }
 0x10c   : > { %v551_v36 = vpop.f32.mrf.mxu0  ;;  %v615_v37 = vpop.f32.mrf.mxu1 }
 0x10d   : > { %v1051_v38 = vpack.c.bf16 %v659_v34, %v658_v32  ;;  %v1091_v39 = vpack.c.bf16 %v675_v35, %v674_v33  ;;  %v552_v42 = vadd.f32 %v1348_v47, %v551_v36  ;;  %v616_v43 = vadd.f32 %v1348_v47, %v615_v37 }
 0x10e   : > { %v553_v40 = vpop.f32.mrf.mxu0  ;;  %v617_v41 = vpop.f32.mrf.mxu1 }
 0x10f   : > { %1119 = vst [vmem:[%s1358_s18 + $0x10] sm:$0xff] %v1051_v38   ;;  %1127 = vst [vmem:[%s1358_s18 + $0x50] sm:$0xff] %v1091_v39   ;;  %v660_v51 = vmax.f32 %v552_v42, 0.0  ;;  %v676_v52 = vmax.f32 %v616_v43, 0.0 }
 0x110   : > { %v554_v44 = vpop.f32.mrf.mxu0  ;;  %v618_v45 = vpop.f32.mrf.mxu1 }
 0x111   : > { %v555_v46 = vadd.f32 %v1348_v47, %v554_v44  ;;  %v619_v48 = vadd.f32 %v1348_v47, %v618_v45 }
 0x112   : > { %v556_v49 = vpop.f32.mrf.mxu0  ;;  %v620_v50 = vpop.f32.mrf.mxu1 }
 0x113   : > { %v661_v53 = vmax.f32 %v555_v46, 0.0  ;;  %v677_v54 = vmax.f32 %v619_v48, 0.0 }
 0x114   : > { %v559_v55 = vpop.f32.mrf.mxu0  ;;  %v623_v56 = vpop.f32.mrf.mxu1 }
 0x115   : > { %v1056_v57 = vpack.c.bf16 %v661_v53, %v660_v51  ;;  %v1096_v58 = vpack.c.bf16 %v677_v54, %v676_v52  ;;  %v560_v61 = vadd.f32 %v1348_v47, %v559_v55  ;;  %v624_v62 = vadd.f32 %v1348_v47, %v623_v56 }
 0x116   : > { %v561_v59 = vpop.f32.mrf.mxu0  ;;  %v625_v60 = vpop.f32.mrf.mxu1 }
 0x117   : > { %1120 = vst [vmem:[%s1358_s18 + $0x18] sm:$0xff] %v1056_v57   ;;  %1128 = vst [vmem:[%s1358_s18 + $0x58] sm:$0xff] %v1096_v58   ;;  %v662_v5 = vmax.f32 %v560_v61, 0.0  ;;  %v678_v6 = vmax.f32 %v624_v62, 0.0 }
 0x118   : > { %v562_v63 = vpop.f32.mrf.mxu0  ;;  %v626_v0 = vpop.f32.mrf.mxu1 }
 0x119   : > { %v563_v1 = vadd.f32 %v1348_v47, %v562_v63  ;;  %v627_v2 = vadd.f32 %v1348_v47, %v626_v0 }
 0x11a   : > { %v564_v3 = vpop.f32.mrf.mxu0  ;;  %v628_v4 = vpop.f32.mrf.mxu1 }
 0x11b   : > { %v663_v7 = vmax.f32 %v563_v1, 0.0  ;;  %v679_v8 = vmax.f32 %v627_v2, 0.0 }
 0x11c   : > { %v567_v9 = vpop.f32.mrf.mxu0  ;;  %v631_v10 = vpop.f32.mrf.mxu1 }
 0x11d   : > { %v1061_v11 = vpack.c.bf16 %v663_v7, %v662_v5  ;;  %v1101_v12 = vpack.c.bf16 %v679_v8, %v678_v6  ;;  %v568_v15 = vadd.f32 %v1348_v47, %v567_v9  ;;  %v632_v16 = vadd.f32 %v1348_v47, %v631_v10 }
 0x11e   : > { %v569_v13 = vpop.f32.mrf.mxu0  ;;  %v633_v14 = vpop.f32.mrf.mxu1 }
 0x11f   : > { %1121 = vst [vmem:[%s1358_s18 + $0x20] sm:$0xff] %v1061_v11   ;;  %1129 = vst [vmem:[%s1358_s18 + $0x60] sm:$0xff] %v1101_v12   ;;  %v664_v23 = vmax.f32 %v568_v15, 0.0  ;;  %v680_v24 = vmax.f32 %v632_v16, 0.0 }
 0x120   : > { %v570_v17 = vpop.f32.mrf.mxu0  ;;  %v634_v18 = vpop.f32.mrf.mxu1 }
 0x121   : > { %v571_v19 = vadd.f32 %v1348_v47, %v570_v17  ;;  %v635_v20 = vadd.f32 %v1348_v47, %v634_v18 }
 0x122   : > { %v572_v21 = vpop.f32.mrf.mxu0  ;;  %v636_v22 = vpop.f32.mrf.mxu1 }
 0x123   : > { %v665_v25 = vmax.f32 %v571_v19, 0.0  ;;  %v681_v26 = vmax.f32 %v635_v20, 0.0 }
 0x124   : > { %v575_v27 = vpop.f32.mrf.mxu0  ;;  %v639_v28 = vpop.f32.mrf.mxu1 }
 0x125   : > { %v1066_v29 = vpack.c.bf16 %v665_v25, %v664_v23  ;;  %v1106_v30 = vpack.c.bf16 %v681_v26, %v680_v24  ;;  %v576_v33 = vadd.f32 %v1348_v47, %v575_v27  ;;  %v640_v34 = vadd.f32 %v1348_v47, %v639_v28 }
 0x126   : > { %v577_v31 = vpop.f32.mrf.mxu0  ;;  %v641_v32 = vpop.f32.mrf.mxu1 }
 0x127   : > { %1122 = vst [vmem:[%s1358_s18 + $0x28] sm:$0xff] %v1066_v29   ;;  %1130 = vst [vmem:[%s1358_s18 + $0x68] sm:$0xff] %v1106_v30   ;;  %v666_v41 = vmax.f32 %v576_v33, 0.0  ;;  %v682_v42 = vmax.f32 %v640_v34, 0.0 }
 0x128   : > { %v578_v35 = vpop.f32.mrf.mxu0  ;;  %v642_v36 = vpop.f32.mrf.mxu1 }
 0x129   : > { %v579_v37 = vadd.f32 %v1348_v47, %v578_v35  ;;  %v643_v38 = vadd.f32 %v1348_v47, %v642_v36 }
 0x12a   : > { %v580_v39 = vpop.f32.mrf.mxu0  ;;  %v644_v40 = vpop.f32.mrf.mxu1 }
 0x12b   : > { %v667_v43 = vmax.f32 %v579_v37, 0.0  ;;  %v683_v44 = vmax.f32 %v643_v38, 0.0 }
 0x12c   : > { %v583_v45 = vpop.f32.mrf.mxu0  ;;  %v647_v46 = vpop.f32.mrf.mxu1 }
 0x12d   : > { %v1071_v48 = vpack.c.bf16 %v667_v43, %v666_v41  ;;  %v1111_v49 = vpack.c.bf16 %v683_v44, %v682_v42  ;;  %v584_v52 = vadd.f32 %v1348_v47, %v583_v45  ;;  %v648_v53 = vadd.f32 %v1348_v47, %v647_v46 }
 0x12e   : > { %v585_v50 = vpop.f32.mrf.mxu0  ;;  %v649_v51 = vpop.f32.mrf.mxu1 }
 0x12f   : > { %1123 = vst [vmem:[%s1358_s18 + $0x30] sm:$0xff] %v1071_v48   ;;  %1131 = vst [vmem:[%s1358_s18 + $0x70] sm:$0xff] %v1111_v49   ;;  %v668_v60 = vmax.f32 %v584_v52, 0.0  ;;  %v684_v61 = vmax.f32 %v648_v53, 0.0 }
 0x130   : > { %v586_v54 = vpop.f32.mrf.mxu0  ;;  %v650_v55 = vpop.f32.mrf.mxu1 }
 0x131   : > { %v587_v56 = vadd.f32 %v1348_v47, %v586_v54  ;;  %v651_v57 = vadd.f32 %v1348_v47, %v650_v55 }
 0x132   : > { %v588_v58 = vpop.f32.mrf.mxu0  ;;  %v652_v59 = vpop.f32.mrf.mxu1 }
 0x133   : > { %v669_v62 = vmax.f32 %v587_v56, 0.0  ;;  %v685_v63 = vmax.f32 %v651_v57, 0.0 }
 0x135   : > { %v1076_v0 = vpack.c.bf16 %v669_v62, %v668_v60  ;;  %v1116_v1 = vpack.c.bf16 %v685_v63, %v684_v61 }
 0x137   : > { %1124 = vst [vmem:[%s1358_s18 + $0x38] sm:$0xff] %v1076_v0   ;;  %1132 = vst [vmem:[%s1358_s18 + $0x78] sm:$0xff] %v1116_v1  }
 0x138 PF: > { %s13_s12 = sadd.s32 1, %s1227_s12  }
 0x139   : > { %p10_p4 = scmp.ge.s32.totalorder %s13_s12, 4  }
 0x13b   :  { %12 = sbr.rel (!%p10_p4) target bundleno = 1 (0x1), region = 62 }

</bundles_post_ra>
